<compile_context>
chip_gen: v6e
topology: v6e:2x2x1
jax: 0.10.0
libtpu: 0.0.40
codegen_flags: <defaults>
</compile_context>

<pallas_src>
import functools

import jax
import jax.numpy as jnp
from jax.experimental import pallas as pl
from jax.experimental.pallas import tpu as pltpu

LN_EPS = 1e-5
_XW_RESIDENT_BYTES = 8 << 20  # keep xw resident in pass 2 below this size


def _round_up(v, m):
    return (v + m - 1) // m * m


# --------------------------- planning / tile sizes ---------------------------

def make_plan(num_nodes, h_dim):
    """Static (Python-int) tiling plan, derived from the chip's VMEM capacity."""
    hp = _round_up(h_dim, 128)                       # lane-dense feature axis
    try:
        vmem_cap = int(pltpu.get_tpu_info().vmem_capacity_bytes)
    except Exception:
        vmem_cap = 64 << 20                          # conservative (v7x per-TC)
    budget = max(int(vmem_cap * 0.70), 16 << 20)

    n128 = _round_up(max(num_nodes, 1), 128)

    def p2_bytes(t):
        np_ = _round_up(num_nodes, t)
        xw_res = np_ * hp * 2 <= _XW_RESIDENT_BYTES
        xw_b = np_ * hp * 2 if xw_res else 2 * t * hp * 2
        return (2 * t * t * 2          # A_hat tile, bf16, double-buffered
                + 2 * xw_b             # xw (resident or streamed)
                + 2 * t * hp * 4       # x row tile, f32
                + 2 * 8 * hp * 4       # bias (sublane-padded)
                + 2 * t * hp * 4)      # output tile, f32

    tile = 128
    for cand in (1024, 512, 256, 128):
        if cand > n128:
            continue
        if p2_bytes(cand) <= budget:
            tile = cand
            break
    # Keep >= 2 row tiles so the "parallel" axis can shard over both v7x TCs.
    while tile > 128 and _round_up(num_nodes, tile) // tile < 2:
        tile //= 2

    n_pad = _round_up(num_nodes, tile)
    xw_resident = n_pad * hp * 2 <= _XW_RESIDENT_BYTES

    def p1_bytes(t_cols):
        return (2 * tile * hp * 4      # x row tile, f32
                + 4 * 8 * hp * 4       # gamma + beta
                + 2 * hp * t_cols * 2  # W^T column tile, bf16
                + 2 * tile * t_cols * 2)  # xw output tile, bf16

    tn = hp                             # column-tile W^T so big H still fits
    while tn % 256 == 0 and p1_bytes(tn) > budget:
        tn //= 2

    cap = max(vmem_cap - (2 << 20), 16 << 20)
    p1_limit = min(max(int(p1_bytes(tn) * 1.3), 16 << 20), cap)
    p2_limit = min(max(int(p2_bytes(tile) * 1.3), 16 << 20), cap)

    return dict(hp=hp, tile=tile, tn=tn, n_pad=n_pad, xw_resident=xw_resident,
                p1_vmem_limit=p1_limit, p2_vmem_limit=p2_limit)


# --------------------------- pass 1: LN + linear -----------------------------

def _ln_linear_kernel(x_ref, gamma_ref, beta_ref, w_ref, xw_ref, *, inv_h):
    x = x_ref[...]                                        # [tm, hp] f32
    # Padded lanes of x / gamma / beta are zero, so unmasked sums are exact.
    mean = jnp.sum(x, axis=-1, keepdims=True) * inv_h
    var = jnp.sum(x * x, axis=-1, keepdims=True) * inv_h - mean * mean
    inv_std = jax.lax.rsqrt(var + LN_EPS)
    gate = (x - mean) * inv_std * gamma_ref[...] + beta_ref[...]
    # bf16 only at the MXU boundary; f32 accumulation.
    xw_ref[...] = jnp.dot(gate.astype(jnp.bfloat16), w_ref[...],
                          preferred_element_type=jnp.float32).astype(xw_ref.dtype)


# ------------------ pass 2: A_hat @ xw, bias, tanh, gate*x -------------------

def _aggregate_kernel(a_ref, xw_ref, x_ref, bias_ref, o_ref, *,
                      xw_resident, tk):
    k = pl.program_id(1)

    @pl.when(k == 0)
    def _():
        o_ref[...] = jnp.zeros_like(o_ref)

    if xw_resident:
        koff = pl.multiple_of(k * tk, tk)
        xw = xw_ref[pl.ds(koff, tk), :]
    else:
        xw = xw_ref[...]

    # Accumulate directly into the resident f32 output block (no VMEM scratch).
    o_ref[...] += jnp.dot(a_ref[...], xw, preferred_element_type=jnp.float32)

    @pl.when(k == pl.num_programs(1) - 1)
    def _():
        o_ref[...] = jnp.tanh(o_ref[...] + bias_ref[...]) * x_ref[...]


# -------------------------------- wrappers -----------------------------------

def build_gcn_adjacency(edge_index, num_nodes, n_pad=None, dtype=jnp.bfloat16):
    """Dense A_hat = D^-1/2 (A + I) D^-1/2 (torch_geometric gcn_norm,
    add_self_loops=True, source_to_target), built ALREADY PADDED to
    (n_pad, n_pad). Build once per graph and reuse across forward calls."""
    if n_pad is None:
        n_pad = num_nodes
    row, col = edge_index[0], edge_index[1]               # source, target
    loops = jnp.arange(num_nodes, dtype=edge_index.dtype)
    row = jnp.concatenate([row, loops])
    col = jnp.concatenate([col, loops])
    ones = jnp.ones(row.shape[0], jnp.float32)
    deg = jnp.zeros((num_nodes,), jnp.float32).at[col].add(ones)
    deg_inv_sqrt = jnp.where(deg > 0, jax.lax.rsqrt(deg), 0.0)
    ew = deg_inv_sqrt[row] * deg_inv_sqrt[col]
    a_hat = jnp.zeros((n_pad, n_pad), jnp.float32).at[col, row].add(ew)
    return a_hat.astype(dtype)


def prepare_params(params, h_dim, hp):
    """Pre-pad parameters once at setup (not per forward call)."""
    f32, bf16 = jnp.float32, jnp.bfloat16
    w_t = jnp.zeros((hp, hp), bf16).at[:h_dim, :h_dim].set(
        params["gcn_weight"].T.astype(bf16))
    bias = jnp.zeros((1, hp), f32).at[0, :h_dim].set(params["gcn_bias"])
    gamma = jnp.zeros((1, hp), f32).at[0, :h_dim].set(params["ln_weight"])
    beta = jnp.zeros((1, hp), f32).at[0, :h_dim].set(params["ln_bias"])
    return {"w_t": w_t, "bias": bias, "gamma": gamma, "beta": beta}


def ggunit_forward(x, a_hat_padded, pp, *, plan):
    """x: [N, H] float; a_hat_padded: [n_pad, n_pad] bf16 (pre-padded);
    pp: prepare_params output; plan: make_plan output (static)."""
    n, h = x.shape
    hp, tile, tn, n_pad = plan["hp"], plan["tile"], plan["tn"], plan["n_pad"]
    f32, bf16 = jnp.float32, jnp.bfloat16

    # Only x is padded per call.
    x_p = jnp.zeros((n_pad, hp), f32).at[:n, :h].set(x.astype(f32))

    # ---- pass 1: xw = LN(x) @ W^T, (row, W^T-column) tiled ----
    p1_cost = pl.CostEstimate(
        flops=2 * n_pad * hp * hp + 8 * n_pad * hp,
        transcendentals=n_pad,
        bytes_accessed=n_pad * hp * 4 + hp * hp * 2 + n_pad * hp * 2)
    xw = pl.pallas_call(
        functools.partial(_ln_linear_kernel, inv_h=1.0 / float(h)),
        out_shape=jax.ShapeDtypeStruct((n_pad, hp), bf16),
        grid=(n_pad // tile, hp // tn),
        in_specs=[
            pl.BlockSpec((tile, hp), lambda i, j: (i, 0)),   # x row tile
            pl.BlockSpec((1, hp), lambda i, j: (0, 0)),      # gamma (resident)
            pl.BlockSpec((1, hp), lambda i, j: (0, 0)),      # beta  (resident)
            pl.BlockSpec((hp, tn), lambda i, j: (0, j)),     # W^T column tile
        ],
        out_specs=pl.BlockSpec((tile, tn), lambda i, j: (i, j)),
        compiler_params=pltpu.CompilerParams(
            dimension_semantics=("parallel", "arbitrary"),
            vmem_limit_bytes=plan["p1_vmem_limit"]),
        cost_estimate=p1_cost,
    )(x_p, pp["gamma"], pp["beta"], pp["w_t"])

    # ---- pass 2: out = tanh(A_hat @ xw + b) * x, (row, reduction) tiled ----
    xw_resident = plan["xw_resident"]
    if xw_resident:
        xw_spec = pl.BlockSpec((n_pad, hp), lambda i, k: (0, 0))
        xw_bytes = n_pad * hp * 2
    else:
        xw_spec = pl.BlockSpec((tile, hp), lambda i, k: (k, 0))
        xw_bytes = (n_pad // tile) * n_pad * hp * 2
    p2_cost = pl.CostEstimate(
        flops=2 * n_pad * n_pad * hp,
        transcendentals=n_pad * hp,
        bytes_accessed=n_pad * n_pad * 2 + xw_bytes + 2 * n_pad * hp * 4)
    out_p = pl.pallas_call(
        functools.partial(_aggregate_kernel, xw_resident=xw_resident, tk=tile),
        out_shape=jax.ShapeDtypeStruct((n_pad, hp), f32),
        grid=(n_pad // tile, n_pad // tile),
        in_specs=[
            pl.BlockSpec((tile, tile), lambda i, k: (i, k)),  # A_hat tile (bf16)
            xw_spec,                                          # xw (bf16)
            pl.BlockSpec((tile, hp), lambda i, k: (i, 0)),    # x row tile (f32)
            pl.BlockSpec((1, hp), lambda i, k: (0, 0)),       # gcn bias
        ],
        out_specs=pl.BlockSpec((tile, hp), lambda i, k: (i, 0)),
        compiler_params=pltpu.CompilerParams(
            dimension_semantics=("parallel", "arbitrary"),
            vmem_limit_bytes=plan["p2_vmem_limit"]),
        cost_estimate=p2_cost,
    )(a_hat_padded, xw, x_p, pp["bias"])

    return out_p[:n, :h].astype(x.dtype)


def init_params(key, h_dim):
    init_eps = 0.001 / h_dim
    (w_key,) = jax.random.split(key, 1)
    return {
        # GCNConv.lin.weight: [out, in], uniform(-init_eps, init_eps)
        "gcn_weight": jax.random.uniform(
            w_key, (h_dim, h_dim), jnp.float32, -init_eps, init_eps),
        # GCNConv.bias: constant 1.0
        "gcn_bias": jnp.ones((h_dim,), jnp.float32),
        # LayerNorm defaults: weight=1, bias=0
        "ln_weight": jnp.ones((h_dim,), jnp.float32),
        "ln_bias": jnp.zeros((h_dim,), jnp.float32),
    }


def ggunit_reference(x, edge_index, params):
    """Pure-JAX f32 reference of GGUnit.forward for validation."""
    n, _ = x.shape
    mean = jnp.mean(x, axis=-1, keepdims=True)
    var = jnp.mean((x - mean) ** 2, axis=-1, keepdims=True)
    gate = ((x - mean) * jax.lax.rsqrt(var + LN_EPS) * params["ln_weight"]
            + params["ln_bias"])
    a_hat = build_gcn_adjacency(edge_index, n, dtype=jnp.float32)
    gate = a_hat @ (gate @ params["gcn_weight"].T) + params["gcn_bias"]
    return jnp.tanh(gate) * x


if __name__ == "__main__":
    key = jax.random.PRNGKey(0)
    n_nodes, h_dim = 8, 32

    xkey, pkey = jax.random.split(key)
    x = jax.random.normal(xkey, (n_nodes, h_dim), jnp.float32)

    # Undirected ring graph: edges in both directions.
    src = jnp.arange(n_nodes, dtype=jnp.int32)
    dst = (src + 1) % n_nodes
    edge_index = jnp.stack(
        [jnp.concatenate([src, dst]), jnp.concatenate([dst, src])], axis=0)

    params = init_params(pkey, h_dim)

    # Built once per graph / parameter set and reused across forward calls:
    plan = make_plan(n_nodes, h_dim)
    a_hat = build_gcn_adjacency(edge_index, n_nodes, n_pad=plan["n_pad"])
    padded_params = prepare_params(params, h_dim, plan["hp"])

    fwd = jax.jit(functools.partial(ggunit_forward, plan=plan))
    out = fwd(x, a_hat, padded_params)
    jax.block_until_ready(out)

    assert out.shape == (n_nodes, h_dim) and out.dtype == jnp.float32
    ref = ggunit_reference(x, edge_index, params)
    err = float(jnp.max(jnp.abs(out - ref)))
    assert jnp.allclose(out, ref, atol=5e-3, rtol=5e-2), (
        "max abs err %.3e" % err)
    print("KERNEL_OK")
</pallas_src>

<mosaic_0001>
module attributes {stable_mosaic.version = 11 : i64} {
  func.func @_aggregate_kernel(%arg0: i32, %arg1: i32, %arg2: memref<128x128xbf16, #tpu.memory_space<vmem>>, %arg3: memref<128x128xbf16, #tpu.memory_space<vmem>>, %arg4: memref<128x128xf32, #tpu.memory_space<vmem>>, %arg5: memref<1x128xf32, #tpu.memory_space<vmem>>, %arg6: memref<128x128xf32, #tpu.memory_space<vmem>>) attributes {dimension_semantics = [#tpu.dimension_semantics<parallel>, #tpu.dimension_semantics<arbitrary>], iteration_bounds = array<i64: 1, 1>, scalar_prefetch = 0 : i64, scratch_operands = 0 : i64, tpu.core_type = #tpu.core_type<tc>, window_params = [{transform_indices = @transform_0, window_bounds = array<i64: 128, 128>}, {pipeline_mode = #tpu.pipeline_mode<synchronous>, transform_indices = @transform_1, window_bounds = array<i64: 128, 128>}, {transform_indices = @transform_2, window_bounds = array<i64: 128, 128>}, {pipeline_mode = #tpu.pipeline_mode<synchronous>, transform_indices = @transform_3, window_bounds = array<i64: 1, 128>}, {transform_indices = @transform_4, window_bounds = array<i64: 128, 128>}]} {
    %c0_i32 = arith.constant 0 : i32
    %0 = arith.cmpi eq, %arg1, %c0_i32 : i32
    %1 = arith.extui %0 : i1 to i32
    %c0_i32_0 = arith.constant 0 : i32
    %2 = arith.cmpi ne, %1, %c0_i32_0 : i32
    scf.if %2 {
      %cst_9 = arith.constant 0.000000e+00 : f32
      %15 = vector.broadcast %cst_9 : f32 to vector<128x128xf32>
      %c0_10 = arith.constant 0 : index
      %c0_11 = arith.constant 0 : index
      %16 = vector.load %arg6[%c0_10, %c0_11] : memref<128x128xf32, #tpu.memory_space<vmem>>, vector<128x128xf32>
      tpu.vector_store %arg6[%c0_10, %c0_11], %15 {strides = array<i32>} : memref<128x128xf32, #tpu.memory_space<vmem>>, vector<128x128xf32>,
    } else {
    }
    %c128_i32 = arith.constant 128 : i32
    %3 = arith.muli %arg1, %c128_i32 : i32
    %4 = tpu.assume_multiple %3, 128 : i32
    %5 = arith.index_cast %4 : i32 to index
    %c0 = arith.constant 0 : index
    %6 = vector.load %arg3[%5, %c0] : memref<128x128xbf16, #tpu.memory_space<vmem>>, vector<128x128xbf16>
    %c0_1 = arith.constant 0 : index
    %c0_2 = arith.constant 0 : index
    %7 = vector.load %arg6[%c0_1, %c0_2] : memref<128x128xf32, #tpu.memory_space<vmem>>, vector<128x128xf32>
    %c0_3 = arith.constant 0 : index
    %c0_4 = arith.constant 0 : index
    %8 = vector.load %arg2[%c0_3, %c0_4] : memref<128x128xbf16, #tpu.memory_space<vmem>>, vector<128x128xbf16>
    %cst = arith.constant dense<0.000000e+00> : vector<128x128xf32>
    %9 = tpu.matmul %8, %6, %cst {dimension_numbers = #tpu.dot_dimension_numbers<[1], [0], [0], [1], [0, 0, 1, 1], [], []>} : vector<128x128xbf16>, vector<128x128xbf16>, vector<128x128xf32> -> vector<128x128xf32>
    %10 = arith.addf %7, %9 : vector<128x128xf32>
    %c0_5 = arith.constant 0 : index
    %c0_6 = arith.constant 0 : index
    %11 = vector.load %arg6[%c0_5, %c0_6] : memref<128x128xf32, #tpu.memory_space<vmem>>, vector<128x128xf32>
    tpu.vector_store %arg6[%c0_5, %c0_6], %10 {strides = array<i32>} : memref<128x128xf32, #tpu.memory_space<vmem>>, vector<128x128xf32>,
    %c0_i32_7 = arith.constant 0 : i32
    %12 = arith.cmpi eq, %arg1, %c0_i32_7 : i32
    %13 = arith.extui %12 : i1 to i32
    %c0_i32_8 = arith.constant 0 : i32
    %14 = arith.cmpi ne, %13, %c0_i32_8 : i32
    scf.if %14 {
      %c0_9 = arith.constant 0 : index
      %c0_10 = arith.constant 0 : index
      %15 = vector.load %arg6[%c0_9, %c0_10] : memref<128x128xf32, #tpu.memory_space<vmem>>, vector<128x128xf32>
      %c0_11 = arith.constant 0 : index
      %c0_12 = arith.constant 0 : index
      %16 = vector.load %arg5[%c0_11, %c0_12] : memref<1x128xf32, #tpu.memory_space<vmem>>, vector<1x128xf32>
      %17 = vector.broadcast %16 : vector<1x128xf32> to vector<128x128xf32>
      %18 = arith.addf %15, %17 : vector<128x128xf32>
      %19 = math.tanh %18 : vector<128x128xf32>
      %c0_13 = arith.constant 0 : index
      %c0_14 = arith.constant 0 : index
      %20 = vector.load %arg4[%c0_13, %c0_14] : memref<128x128xf32, #tpu.memory_space<vmem>>, vector<128x128xf32>
      %21 = arith.mulf %19, %20 : vector<128x128xf32>
      %c0_15 = arith.constant 0 : index
      %c0_16 = arith.constant 0 : index
      %22 = vector.load %arg6[%c0_15, %c0_16] : memref<128x128xf32, #tpu.memory_space<vmem>>, vector<128x128xf32>
      tpu.vector_store %arg6[%c0_15, %c0_16], %21 {strides = array<i32>} : memref<128x128xf32, #tpu.memory_space<vmem>>, vector<128x128xf32>,
    } else {
    }
    return
  }
  func.func @transform_0(%arg0: i32, %arg1: i32) -> (i32, i32) {
    %c0_i32 = arith.constant 0 : i32
    return %arg0, %arg1 : i32, i32
  }
  func.func @transform_1(%arg0: i32, %arg1: i32) -> (i32, i32) {
    %c0_i32 = arith.constant 0 : i32
    %c0_i32_0 = arith.constant 0 : i32
    %c0_i32_1 = arith.constant 0 : i32
    return %c0_i32, %c0_i32_0 : i32, i32
  }
  func.func @transform_2(%arg0: i32, %arg1: i32) -> (i32, i32) {
    %c0_i32 = arith.constant 0 : i32
    %c0_i32_0 = arith.constant 0 : i32
    return %arg0, %c0_i32 : i32, i32
  }
  func.func @transform_3(%arg0: i32, %arg1: i32) -> (i32, i32) {
    %c0_i32 = arith.constant 0 : i32
    %c0_i32_0 = arith.constant 0 : i32
    %c0_i32_1 = arith.constant 0 : i32
    return %c0_i32, %c0_i32_0 : i32, i32
  }
  func.func @transform_4(%arg0: i32, %arg1: i32) -> (i32, i32) {
    %c0_i32 = arith.constant 0 : i32
    %c0_i32_0 = arith.constant 0 : i32
    return %arg0, %c0_i32 : i32, i32
  }
}

module attributes {stable_mosaic.version = 11 : i64} {
  func.func @_ln_linear_kernel(%arg0: i32, %arg1: i32, %arg2: memref<128x128xf32, #tpu.memory_space<vmem>>, %arg3: memref<1x128xf32, #tpu.memory_space<vmem>>, %arg4: memref<1x128xf32, #tpu.memory_space<vmem>>, %arg5: memref<128x128xbf16, #tpu.memory_space<vmem>>, %arg6: memref<128x128xbf16, #tpu.memory_space<vmem>>) attributes {dimension_semantics = [#tpu.dimension_semantics<parallel>, #tpu.dimension_semantics<arbitrary>], iteration_bounds = array<i64: 1, 1>, scalar_prefetch = 0 : i64, scratch_operands = 0 : i64, tpu.core_type = #tpu.core_type<tc>, window_params = [{transform_indices = @transform_0, window_bounds = array<i64: 128, 128>}, {pipeline_mode = #tpu.pipeline_mode<synchronous>, transform_indices = @transform_1, window_bounds = array<i64: 1, 128>}, {pipeline_mode = #tpu.pipeline_mode<synchronous>, transform_indices = @transform_2, window_bounds = array<i64: 1, 128>}, {transform_indices = @transform_3, window_bounds = array<i64: 128, 128>}, {transform_indices = @transform_4, window_bounds = array<i64: 128, 128>}]} {
    %c0 = arith.constant 0 : index
    %c0_0 = arith.constant 0 : index
    %0 = vector.load %arg2[%c0, %c0_0] : memref<128x128xf32, #tpu.memory_space<vmem>>, vector<128x128xf32>
    %cst = arith.constant dense<0.000000e+00> : vector<128xf32>
    %1 = vector.multi_reduction <add>, %0, %cst [1] : vector<128x128xf32> to vector<128xf32>
    %2 = vector.shape_cast %1 : vector<128xf32> to vector<128x1xf32>
    %cst_1 = arith.constant 3.125000e-02 : f32
    %3 = vector.broadcast %cst_1 : f32 to vector<128x1xf32>
    %4 = arith.mulf %2, %3 : vector<128x1xf32>
    %5 = arith.mulf %0, %0 : vector<128x128xf32>
    %cst_2 = arith.constant dense<0.000000e+00> : vector<128xf32>
    %6 = vector.multi_reduction <add>, %5, %cst_2 [1] : vector<128x128xf32> to vector<128xf32>
    %7 = vector.shape_cast %6 : vector<128xf32> to vector<128x1xf32>
    %cst_3 = arith.constant 3.125000e-02 : f32
    %8 = vector.broadcast %cst_3 : f32 to vector<128x1xf32>
    %9 = arith.mulf %7, %8 : vector<128x1xf32>
    %10 = arith.mulf %4, %4 : vector<128x1xf32>
    %11 = arith.subf %9, %10 : vector<128x1xf32>
    %cst_4 = arith.constant 9.99999974E-6 : f32
    %12 = vector.broadcast %cst_4 : f32 to vector<128x1xf32>
    %13 = arith.addf %11, %12 : vector<128x1xf32>
    %14 = math.rsqrt %13 : vector<128x1xf32>
    %15 = vector.broadcast %4 : vector<128x1xf32> to vector<128x128xf32>
    %16 = arith.subf %0, %15 : vector<128x128xf32>
    %17 = vector.broadcast %14 : vector<128x1xf32> to vector<128x128xf32>
    %18 = arith.mulf %16, %17 : vector<128x128xf32>
    %c0_5 = arith.constant 0 : index
    %c0_6 = arith.constant 0 : index
    %19 = vector.load %arg3[%c0_5, %c0_6] : memref<1x128xf32, #tpu.memory_space<vmem>>, vector<1x128xf32>
    %20 = vector.broadcast %19 : vector<1x128xf32> to vector<128x128xf32>
    %21 = arith.mulf %18, %20 : vector<128x128xf32>
    %c0_7 = arith.constant 0 : index
    %c0_8 = arith.constant 0 : index
    %22 = vector.load %arg4[%c0_7, %c0_8] : memref<1x128xf32, #tpu.memory_space<vmem>>, vector<1x128xf32>
    %23 = vector.broadcast %22 : vector<1x128xf32> to vector<128x128xf32>
    %24 = arith.addf %21, %23 : vector<128x128xf32>
    %25 = arith.truncf %24 : vector<128x128xf32> to vector<128x128xbf16>
    %c0_9 = arith.constant 0 : index
    %c0_10 = arith.constant 0 : index
    %26 = vector.load %arg5[%c0_9, %c0_10] : memref<128x128xbf16, #tpu.memory_space<vmem>>, vector<128x128xbf16>
    %cst_11 = arith.constant dense<0.000000e+00> : vector<128x128xf32>
    %27 = tpu.matmul %25, %26, %cst_11 {dimension_numbers = #tpu.dot_dimension_numbers<[1], [0], [0], [1], [0, 0, 1, 1], [], []>} : vector<128x128xbf16>, vector<128x128xbf16>, vector<128x128xf32> -> vector<128x128xf32>
    %28 = arith.truncf %27 : vector<128x128xf32> to vector<128x128xbf16>
    %c0_12 = arith.constant 0 : index
    %c0_13 = arith.constant 0 : index
    %29 = vector.load %arg6[%c0_12, %c0_13] : memref<128x128xbf16, #tpu.memory_space<vmem>>, vector<128x128xbf16>
    tpu.vector_store %arg6[%c0_12, %c0_13], %28 {strides = array<i32>} : memref<128x128xbf16, #tpu.memory_space<vmem>>, vector<128x128xbf16>,
    return
  }
  func.func @transform_0(%arg0: i32, %arg1: i32) -> (i32, i32) {
    %c0_i32 = arith.constant 0 : i32
    %c0_i32_0 = arith.constant 0 : i32
    return %arg0, %c0_i32 : i32, i32
  }
  func.func @transform_1(%arg0: i32, %arg1: i32) -> (i32, i32) {
    %c0_i32 = arith.constant 0 : i32
    %c0_i32_0 = arith.constant 0 : i32
    %c0_i32_1 = arith.constant 0 : i32
    return %c0_i32, %c0_i32_0 : i32, i32
  }
  func.func @transform_2(%arg0: i32, %arg1: i32) -> (i32, i32) {
    %c0_i32 = arith.constant 0 : i32
    %c0_i32_0 = arith.constant 0 : i32
    %c0_i32_1 = arith.constant 0 : i32
    return %c0_i32, %c0_i32_0 : i32, i32
  }
  func.func @transform_3(%arg0: i32, %arg1: i32) -> (i32, i32) {
    %c0_i32 = arith.constant 0 : i32
    %c0_i32_0 = arith.constant 0 : i32
    return %c0_i32, %arg1 : i32, i32
  }
  func.func @transform_4(%arg0: i32, %arg1: i32) -> (i32, i32) {
    %c0_i32 = arith.constant 0 : i32
    return %arg0, %arg1 : i32, i32
  }
}

</mosaic_0001>

<bundles_post_ra>
// kernel: ggunit_forward.3
= control target key start
LH: loop header
LB: loop body
LE: loop exit
PB: predicated region body
PF: predicated region fallthrough
CT: control target
= control target key end

     0   :  { %s730_s1 = inlined_call_operand.vmem [shape: bf16[128,128], index: 1, kind: input, shape index: {}]   ;;  %s731_s0 = inlined_call_operand.vmem [shape: bf16[128,128], index: 0, kind: input, shape index: {}]   ;;  %s732_s3 = inlined_call_operand.vmem [shape: f32[1,128], index: 3, kind: input, shape index: {}]   ;;  %s733_s2 = inlined_call_operand.vmem [shape: f32[128,128], index: 2, kind: input, shape index: {}]   ;;  %s734_s4 = inlined_call_operand.vmem [shape: f32[128,128], index: 4, kind: output, shape index: {}]  }
   0x1   :  { %v510_v0 = vld [vmem:[%s730_s1 + $0x38] sm:$0xff]   ;;  %v511_v1 = vld [vmem:[%s730_s1 + $0x30] sm:$0xff]   ;;  %v512_v2 = vld [vmem:[%s730_s1 + $0x28] sm:$0xff]  }
   0x2   :  { %461 = vmatprep.subr.bf16.mxu0 %v510_v0  ;;  %493 = vmatprep.subr.bf16.mxu1 %v510_v0  ;;  %v513_v3 = vld [vmem:[%s730_s1 + $0x20] sm:$0xff]   ;;  %v514_v6 = vld [vmem:[%s730_s1 + $0x18] sm:$0xff]   ;;  %v515_v7 = vld [vmem:[%s730_s1 + $0x10] sm:$0xff]  }
   0x3   :  { %462 = vmatpush3.bf16.msra.mxu0 %v510_v0  ;;  %501 = vmatpush3.bf16.msra.mxu1 %v510_v0  ;;  %v518_v4 = vld [vmem:[%s731_s0] sm:$0xff]   ;;  %v516_v8 = vld [vmem:[%s730_s1 + $0x8] sm:$0xff]   ;;  %v522_v12 = vld [vmem:[%s731_s0 + $0x10] sm:$0xff]  }
   0x4   :  { %463 = vmatprep.subr.bf16.mxu0 %v511_v1  ;;  %494 = vmatprep.subr.bf16.mxu1 %v511_v1  ;;  %v519_v5 = vld [vmem:[%s731_s0 + $0x20] sm:$0xff]   ;;  %v520_v10 = vld [vmem:[%s731_s0 + $0x8] sm:$0xff]   ;;  %v523_v13 = vld [vmem:[%s731_s0 + $0x30] sm:$0xff]  }
   0x5   :  { %477 = vmatprep.mubr.bf16.mxu0 %v518_v4  ;;  %485 = vmatprep.mubr.bf16.mxu1 %v519_v5  ;;  %v517_v9 = vld [vmem:[%s730_s1] sm:$0xff]   ;;  %v521_v11 = vld [vmem:[%s731_s0 + $0x28] sm:$0xff]   ;;  %v524_v14 = vld [vmem:[%s731_s0 + $0x18] sm:$0xff]  }
   0x6   :  { %v525_v15 = vld [vmem:[%s731_s0 + $0x38] sm:$0xff]   ;;  %v444_v17 = vld [vmem:[%s732_s3] ss:$0 sm:$0xff]  ;;  %v376_v46 = vld [vmem:[%s733_s2 + $0x10] sm:$0xff] }
   0x7   :  { %464 = vmatpush3.bf16.msra.mxu0 %v511_v1  ;;  %502 = vmatpush3.bf16.msra.mxu1 %v511_v1  ;;  %v384_v48 = vld [vmem:[%s733_s2 + $0x50] sm:$0xff]  ;;  %v374_v52 = vld [vmem:[%s733_s2] sm:$0xff]  ;;  %v377_v58 = vld [vmem:[%s733_s2 + $0x18] sm:$0xff] }
   0x8   :  { %465 = vmatprep.subr.bf16.mxu0 %v512_v2  ;;  %495 = vmatprep.subr.bf16.mxu1 %v512_v2  ;;  %v382_v55 = vld [vmem:[%s733_s2 + $0x40] sm:$0xff]  ;;  %v385_v61 = vld [vmem:[%s733_s2 + $0x58] sm:$0xff]  ;;  %v375_v0 = vld [vmem:[%s733_s2 + $0x8] sm:$0xff] }
   0xb   :  { %466 = vmatpush3.bf16.msra.mxu0 %v512_v2  ;;  %503 = vmatpush3.bf16.msra.mxu1 %v512_v2 }
   0xc   :  { %467 = vmatprep.subr.bf16.mxu0 %v513_v3  ;;  %496 = vmatprep.subr.bf16.mxu1 %v513_v3 }
   0xf   :  { %468 = vmatpush3.bf16.msra.mxu0 %v513_v3  ;;  %504 = vmatpush3.bf16.msra.mxu1 %v513_v3  ;;  %v383_v3 = vld [vmem:[%s733_s2 + $0x48] sm:$0xff] }
  0x10   :  { %469 = vmatprep.subr.bf16.mxu0 %v514_v6  ;;  %497 = vmatprep.subr.bf16.mxu1 %v514_v6 }
  0x13   :  { %470 = vmatpush3.bf16.msra.mxu0 %v514_v6  ;;  %505 = vmatpush3.bf16.msra.mxu1 %v514_v6  ;;  %v380_v6 = vld [vmem:[%s733_s2 + $0x30] sm:$0xff] }
  0x14   :  { %471 = vmatprep.subr.bf16.mxu0 %v515_v7  ;;  %498 = vmatprep.subr.bf16.mxu1 %v515_v7 }
  0x17   :  { %472 = vmatpush3.bf16.msra.mxu0 %v515_v7  ;;  %506 = vmatpush3.bf16.msra.mxu1 %v515_v7 }
  0x18   :  { %473 = vmatprep.subr.bf16.mxu0 %v516_v8  ;;  %499 = vmatprep.subr.bf16.mxu1 %v516_v8 }
  0x1b   :  { %474 = vmatpush3.bf16.msra.mxu0 %v516_v8  ;;  %507 = vmatpush3.bf16.msra.mxu1 %v516_v8 }
  0x1c   :  { %475 = vmatprep.subr.bf16.mxu0 %v517_v9  ;;  %500 = vmatprep.subr.bf16.mxu1 %v517_v9 }
  0x1f   :  { %476 = vmatpush3.bf16.msra.mxu0 %v517_v9  ;;  %508 = vmatpush3.bf16.msra.mxu1 %v517_v9  ;;  %v388_v9 = vld [vmem:[%s733_s2 + $0x70] sm:$0xff] }
  0x22   :  { %478 = vmatmul.mubr.bf16.vlgmr.msra.gmra.mxu0 %v520_v10  ;;  %486 = vmatmul.mubr.bf16.vlgmr.msra.gmra.mxu1 %v521_v11 }
  0x23   :  { %481 = vmatprep.mubr.bf16.mxu0 %v522_v12  ;;  %489 = vmatprep.mubr.bf16.mxu1 %v523_v13  ;;  %v378_v12 = vld [vmem:[%s733_s2 + $0x20] sm:$0xff] }
  0x2a   :  { %482 = vmatmul.mubr.bf16.gmra.mxu0 %v524_v14  ;;  %490 = vmatmul.mubr.bf16.gmra.mxu1 %v525_v15  ;;  %v386_v15 = vld [vmem:[%s733_s2 + $0x60] sm:$0xff] }
  0xe2   :  { %v479_v16 = vpop.f32.mrf.mxu0  ;;  %v487_v18 = vpop.f32.mrf.mxu1 }
  0xe3   :  { %v344_v21 = vadd.f32 %v479_v16, %v444_v17  ;;  %v352_v22 = vadd.f32 %v487_v18, %v444_v17  ;;  %v381_v18 = vld [vmem:[%s733_s2 + $0x38] sm:$0xff] }
  0xe4   :  { %v221_v19 = vpop.f32.mrf.mxu0  ;;  %v253_v20 = vpop.f32.mrf.mxu1 }
  0xe5   :  { %526 = vtanh.f32 %v344_v21  ;;  %v342_v25 = vadd.f32 %v444_v17, %v221_v19  ;;  %v350_v26 = vadd.f32 %v444_v17, %v253_v20  ;;  %v389_v21 = vld [vmem:[%s733_s2 + $0x78] sm:$0xff] }
  0xe6   :  { %v480_v23 = vpop.f32.mrf.mxu0  ;;  %v488_v24 = vpop.f32.mrf.mxu1  ;;  %528 = vtanh.f32 %v352_v22 }
  0xe7   :  { %530 = vtanh.f32 %v342_v25  ;;  %v345_v29 = vadd.f32 %v480_v23, %v444_v17  ;;  %v353_v30 = vadd.f32 %v488_v24, %v444_v17  ;;  %v379_v24 = vld [vmem:[%s733_s2 + $0x28] sm:$0xff] }
  0xe8   :  { %v224_v27 = vpop.f32.mrf.mxu0  ;;  %v256_v28 = vpop.f32.mrf.mxu1  ;;  %532 = vtanh.f32 %v350_v26 }
  0xe9   :  { %534 = vtanh.f32 %v345_v29  ;;  %v343_v33 = vadd.f32 %v444_v17, %v224_v27  ;;  %v351_v34 = vadd.f32 %v444_v17, %v256_v28  ;;  %v387_v27 = vld [vmem:[%s733_s2 + $0x68] sm:$0xff] }
  0xea   :  { %v483_v31 = vpop.f32.mrf.mxu0  ;;  %v491_v32 = vpop.f32.mrf.mxu1  ;;  %536 = vtanh.f32 %v353_v30 }
  0xeb   :  { %538 = vtanh.f32 %v343_v33  ;;  %v348_v37 = vadd.f32 %v483_v31, %v444_v17  ;;  %v356_v38 = vadd.f32 %v491_v32, %v444_v17 }
  0xec   :  { %v237_v35 = vpop.f32.mrf.mxu0  ;;  %v269_v36 = vpop.f32.mrf.mxu1  ;;  %540 = vtanh.f32 %v351_v34 }
  0xed   :  { %542 = vtanh.f32 %v348_v37  ;;  %v346_v41 = vadd.f32 %v444_v17, %v237_v35  ;;  %v354_v42 = vadd.f32 %v444_v17, %v269_v36 }
  0xee   :  { %v484_v39 = vpop.f32.mrf.mxu0  ;;  %v492_v40 = vpop.f32.mrf.mxu1  ;;  %544 = vtanh.f32 %v356_v38 }
  0xef   :  { %546 = vtanh.f32 %v346_v41  ;;  %v349_v45 = vadd.f32 %v484_v39, %v444_v17  ;;  %v357_v47 = vadd.f32 %v492_v40, %v444_v17 }
  0xf0   :  { %v240_v43 = vpop.f32.mrf.mxu0  ;;  %v272_v44 = vpop.f32.mrf.mxu1  ;;  %548 = vtanh.f32 %v354_v42 }
  0xf1   :  { %550 = vtanh.f32 %v349_v45  ;;  %v347_v49 = vadd.f32 %v444_v17, %v240_v43  ;;  %v355_v50 = vadd.f32 %v444_v17, %v272_v44 }
  0xf2   :  { %v527_v51 = vpop.eup %526  ;;  %552 = vtanh.f32 %v357_v47 }
  0xf3   :  { %v529_v53 = vpop.eup %528  ;;  %v392_v54 = vmul.f32 %v527_v51, %v376_v46  ;;  %554 = vtanh.f32 %v347_v49 }
  0xf4   :  { %v531_v56 = vpop.eup %530  ;;  %v400_v57 = vmul.f32 %v529_v53, %v384_v48  ;;  %556 = vtanh.f32 %v355_v50 }
  0xf5   :  { %v533_v59 = vpop.eup %532  ;;  %408 = vst [vmem:[%s734_s4 + $0x10] sm:$0xff] %v392_v54  ;;  %v390_v60 = vmul.f32 %v531_v56, %v374_v52 }
  0xf6   :  { %v535_v62 = vpop.eup %534  ;;  %416 = vst [vmem:[%s734_s4 + $0x50] sm:$0xff] %v400_v57  ;;  %v398_v63 = vmul.f32 %v533_v59, %v382_v55 }
  0xf7   :  { %v537_v1 = vpop.eup %536  ;;  %406 = vst [vmem:[%s734_s4] sm:$0xff] %v390_v60  ;;  %v393_v2 = vmul.f32 %v535_v62, %v377_v58 }
  0xf8   :  { %v539_v4 = vpop.eup %538  ;;  %414 = vst [vmem:[%s734_s4 + $0x40] sm:$0xff] %v398_v63  ;;  %v401_v5 = vmul.f32 %v537_v1, %v385_v61 }
  0xf9   :  { %v541_v7 = vpop.eup %540  ;;  %409 = vst [vmem:[%s734_s4 + $0x18] sm:$0xff] %v393_v2  ;;  %v391_v8 = vmul.f32 %v539_v4, %v375_v0 }
  0xfa   :  { %v543_v10 = vpop.eup %542  ;;  %417 = vst [vmem:[%s734_s4 + $0x58] sm:$0xff] %v401_v5  ;;  %v399_v11 = vmul.f32 %v541_v7, %v383_v3 }
  0xfb   :  { %v545_v13 = vpop.eup %544  ;;  %407 = vst [vmem:[%s734_s4 + $0x8] sm:$0xff] %v391_v8  ;;  %v396_v14 = vmul.f32 %v543_v10, %v380_v6 }
  0xfc   :  { %v547_v16 = vpop.eup %546  ;;  %415 = vst [vmem:[%s734_s4 + $0x48] sm:$0xff] %v399_v11  ;;  %v404_v17 = vmul.f32 %v545_v13, %v388_v9 }
  0xfd   :  { %v549_v19 = vpop.eup %548  ;;  %412 = vst [vmem:[%s734_s4 + $0x30] sm:$0xff] %v396_v14  ;;  %v394_v20 = vmul.f32 %v547_v16, %v378_v12 }
  0xfe   :  { %v551_v22 = vpop.eup %550  ;;  %420 = vst [vmem:[%s734_s4 + $0x70] sm:$0xff] %v404_v17  ;;  %v402_v23 = vmul.f32 %v549_v19, %v386_v15 }
  0xff   :  { %v553_v25 = vpop.eup %552  ;;  %410 = vst [vmem:[%s734_s4 + $0x20] sm:$0xff] %v394_v20  ;;  %v397_v26 = vmul.f32 %v551_v22, %v381_v18 }
 0x100   :  { %v555_v28 = vpop.eup %554  ;;  %418 = vst [vmem:[%s734_s4 + $0x60] sm:$0xff] %v402_v23  ;;  %v405_v29 = vmul.f32 %v553_v25, %v389_v21 }
 0x101   :  { %v557_v30 = vpop.eup %556  ;;  %413 = vst [vmem:[%s734_s4 + $0x38] sm:$0xff] %v397_v26  ;;  %v395_v31 = vmul.f32 %v555_v28, %v379_v24 }
 0x102   :  { %421 = vst [vmem:[%s734_s4 + $0x78] sm:$0xff] %v405_v29  ;;  %v403_v32 = vmul.f32 %v557_v30, %v387_v27 }
 0x103   :  { %411 = vst [vmem:[%s734_s4 + $0x28] sm:$0xff] %v395_v31 }
 0x104   :  { %419 = vst [vmem:[%s734_s4 + $0x68] sm:$0xff] %v403_v32 }

// kernel: ggunit_forward.2
= control target key start
LH: loop header
LB: loop body
LE: loop exit
PB: predicated region body
PF: predicated region fallthrough
CT: control target
= control target key end

     0   :  { %s1073_s0 = inlined_call_operand.vmem [shape: f32[128,128], index: 0, kind: input, shape index: {}]   ;;  %s1074_s3 = inlined_call_operand.vmem [shape: bf16[128,128], index: 3, kind: input, shape index: {}]   ;;  %s1075_s1 = inlined_call_operand.vmem [shape: f32[1,128], index: 1, kind: input, shape index: {}]   ;;  %s1076_s2 = inlined_call_operand.vmem [shape: f32[1,128], index: 2, kind: input, shape index: {}]   ;;  %s1077_s4 = inlined_call_operand.vmem [shape: bf16[128,128], index: 4, kind: output, shape index: {}]  }
   0x1   :  { %v762_v0 = vld [vmem:[%s1073_s0 + $0x40] sm:$0xff]  ;;  %v774_v2 = vld [vmem:[%s1073_s0 + $0x48] sm:$0xff]  ;;  %v786_v4 = vld [vmem:[%s1073_s0 + $0x18] sm:$0xff] }
   0x2   :  { %v767_v1 = vld [vmem:[%s1073_s0] sm:$0xff]  ;;  %50 = vadd.xlane.f32.xlu1 %v762_v0  ;;  %v779_v3 = vld [vmem:[%s1073_s0 + $0x8] sm:$0xff]  ;;  %v791_v5 = vld [vmem:[%s1073_s0 + $0x10] sm:$0xff]  ;;  %v91_v10 = vmul.f32 %v774_v2, %v774_v2  ;;  %v90_v11 = vmul.f32 %v762_v0, %v762_v0  ;;  %v85_v12 = vmul.f32 %v786_v4, %v786_v4 }
   0x3   :  { %34 = vadd.xlane.f32.xlu0 %v767_v1  ;;  %v798_v6 = vld [vmem:[%s1073_s0 + $0x58] sm:$0xff]  ;;  %v803_v7 = vld [vmem:[%s1073_s0 + $0x50] sm:$0xff]  ;;  %v83_v8 = vmul.f32 %v779_v3, %v779_v3  ;;  %v82_v9 = vmul.f32 %v767_v1, %v767_v1  ;;  %v84_v13 = vmul.f32 %v791_v5, %v791_v5  ;;  %v826_v16 = vld [vmem:[%s1073_s0 + $0x28] sm:$0xff] }
   0x4   :  { %v93_v14 = vmul.f32 %v798_v6, %v798_v6  ;;  %v92_v15 = vmul.f32 %v803_v7, %v803_v7  ;;  %v831_v17 = vld [vmem:[%s1073_s0 + $0x20] sm:$0xff]  ;;  %v694_v18 = vld [vmem:[%s1074_s3 + $0x38] sm:$0xff]   ;;  %v839_v19 = vld [vmem:[%s1073_s0 + $0x68] sm:$0xff]  ;;  %v87_v28 = vmul.f32 %v826_v16, %v826_v16 }
   0x5   :  { %v844_v20 = vld [vmem:[%s1073_s0 + $0x60] sm:$0xff]  ;;  %646 = vmatprep.subr.bf16.mxu0 %v694_v18  ;;  %678 = vmatprep.subr.bf16.mxu1 %v694_v18  ;;  %v695_v21 = vld [vmem:[%s1074_s3 + $0x30] sm:$0xff]   ;;  %v856_v22 = vld [vmem:[%s1073_s0 + $0x38] sm:$0xff]  ;;  %v86_v29 = vmul.f32 %v831_v17, %v831_v17  ;;  %v95_v31 = vmul.f32 %v839_v19, %v839_v19 }
   0x6   :  { %52 = vadd.xlane.f32.xlu1 %v774_v2  ;;  %647 = vmatpush3.bf16.msra.mxu0 %v694_v18  ;;  %v861_v23 = vld [vmem:[%s1073_s0 + $0x30] sm:$0xff]  ;;  %v696_v24 = vld [vmem:[%s1074_s3 + $0x28] sm:$0xff]   ;;  %v871_v25 = vld [vmem:[%s1073_s0 + $0x78] sm:$0xff]  ;;  %v94_v32 = vmul.f32 %v844_v20, %v844_v20  ;;  %v89_v34 = vmul.f32 %v856_v22, %v856_v22 }
   0x7   :  { %36 = vadd.xlane.f32.xlu0 %v779_v3  ;;  %686 = vmatpush3.bf16.msra.mxu1 %v694_v18  ;;  %v876_v26 = vld [vmem:[%s1073_s0 + $0x70] sm:$0xff]  ;;  %v697_v27 = vld [vmem:[%s1074_s3 + $0x20] sm:$0xff]   ;;  %v698_v30 = vld [vmem:[%s1074_s3 + $0x18] sm:$0xff]   ;;  %v88_v35 = vmul.f32 %v861_v23, %v861_v23  ;;  %v97_v37 = vmul.f32 %v871_v25, %v871_v25 }
   0x8   :  { %648 = vmatprep.subr.bf16.mxu0 %v695_v21  ;;  %679 = vmatprep.subr.bf16.mxu1 %v695_v21  ;;  %v699_v33 = vld [vmem:[%s1074_s3 + $0x10] sm:$0xff]   ;;  %v700_v36 = vld [vmem:[%s1074_s3 + $0x8] sm:$0xff]   ;;  %v96_v38 = vmul.f32 %v876_v26, %v876_v26  ;;  %v701_v39 = vld [vmem:[%s1074_s3] sm:$0xff]  }
   0xa   :  { %40 = vadd.xlane.f32.xlu1 %v786_v4  ;;  %649 = vmatpush3.bf16.msra.mxu0 %v695_v21 }
   0xb   :  { %38 = vadd.xlane.f32.xlu0 %v791_v5  ;;  %687 = vmatpush3.bf16.msra.mxu1 %v695_v21 }
   0xc   :  { %650 = vmatprep.subr.bf16.mxu0 %v696_v24  ;;  %680 = vmatprep.subr.bf16.mxu1 %v696_v24 }
   0xe   :  { %56 = vadd.xlane.f32.xlu1 %v798_v6  ;;  %651 = vmatpush3.bf16.msra.mxu0 %v696_v24 }
   0xf   :  { %54 = vadd.xlane.f32.xlu0 %v803_v7  ;;  %688 = vmatpush3.bf16.msra.mxu1 %v696_v24 }
  0x10   :  { %652 = vmatprep.subr.bf16.mxu0 %v697_v27  ;;  %681 = vmatprep.subr.bf16.mxu1 %v697_v27 }
  0x12   :  { %100 = vadd.xlane.f32.xlu1 %v83_v8  ;;  %653 = vmatpush3.bf16.msra.mxu0 %v697_v27 }
  0x13   :  { %98 = vadd.xlane.f32.xlu0 %v82_v9  ;;  %689 = vmatpush3.bf16.msra.mxu1 %v697_v27 }
  0x14   :  { %654 = vmatprep.subr.bf16.mxu0 %v698_v30  ;;  %682 = vmatprep.subr.bf16.mxu1 %v698_v30 }
  0x16   :  { %116 = vadd.xlane.f32.xlu1 %v91_v10  ;;  %655 = vmatpush3.bf16.msra.mxu0 %v698_v30 }
  0x17   :  { %114 = vadd.xlane.f32.xlu0 %v90_v11  ;;  %690 = vmatpush3.bf16.msra.mxu1 %v698_v30 }
  0x18   :  { %656 = vmatprep.subr.bf16.mxu0 %v699_v33  ;;  %683 = vmatprep.subr.bf16.mxu1 %v699_v33 }
  0x1a   :  { %104 = vadd.xlane.f32.xlu1 %v85_v12  ;;  %657 = vmatpush3.bf16.msra.mxu0 %v699_v33 }
  0x1b   :  { %102 = vadd.xlane.f32.xlu0 %v84_v13  ;;  %691 = vmatpush3.bf16.msra.mxu1 %v699_v33 }
  0x1c   :  { %658 = vmatprep.subr.bf16.mxu0 %v700_v36  ;;  %684 = vmatprep.subr.bf16.mxu1 %v700_v36 }
  0x1e   :  { %120 = vadd.xlane.f32.xlu1 %v93_v14  ;;  %659 = vmatpush3.bf16.msra.mxu0 %v700_v36 }
  0x1f   :  { %118 = vadd.xlane.f32.xlu0 %v92_v15  ;;  %692 = vmatpush3.bf16.msra.mxu1 %v700_v36 }
  0x20   :  { %660 = vmatprep.subr.bf16.mxu0 %v701_v39  ;;  %685 = vmatprep.subr.bf16.mxu1 %v701_v39 }
  0x22   :  { %44 = vadd.xlane.f32.xlu1 %v826_v16  ;;  %661 = vmatpush3.bf16.msra.mxu0 %v701_v39 }
  0x23   :  { %42 = vadd.xlane.f32.xlu0 %v831_v17  ;;  %693 = vmatpush3.bf16.msra.mxu1 %v701_v39 }
  0x26   :  { %60 = vadd.xlane.f32.xlu1 %v839_v19 }
  0x27   :  { %58 = vadd.xlane.f32.xlu0 %v844_v20 }
  0x2a   :  { %48 = vadd.xlane.f32.xlu1 %v856_v22 }
  0x2b   :  { %46 = vadd.xlane.f32.xlu0 %v861_v23 }
  0x2e   :  { %64 = vadd.xlane.f32.xlu1 %v871_v25 }
  0x2f   :  { %62 = vadd.xlane.f32.xlu0 %v876_v26 }
  0x32   :  { %108 = vadd.xlane.f32.xlu1 %v87_v28 }
  0x33   :  { %106 = vadd.xlane.f32.xlu0 %v86_v29 }
  0x36   :  { %124 = vadd.xlane.f32.xlu1 %v95_v31 }
  0x37   :  { %122 = vadd.xlane.f32.xlu0 %v94_v32 }
  0x3a   :  { %112 = vadd.xlane.f32.xlu1 %v89_v34 }
  0x3b   :  { %110 = vadd.xlane.f32.xlu0 %v88_v35 }
  0x3e   :  { %128 = vadd.xlane.f32.xlu1 %v97_v37 }
  0x3f   :  { %126 = vadd.xlane.f32.xlu0 %v96_v38 }
  0x8b   :  { %v51_v40 = vpop.xlane.xlu1 %50 }
  0x8c   :  { %v35_v41 = vpop.xlane.xlu0 %34  ;;  %v915_v50 = vmul.f32 0.03125, %v51_v40 }
  0x8d   :  { %v911_v48 = vmul.f32 0.03125, %v35_v41 }
  0x8e   :  { %v154_v61 = vmul.f32 %v915_v50, %v915_v50 }
  0x8f   :  { %v53_v42 = vpop.xlane.xlu1 %52  ;;  %v146_v54 = vmul.f32 %v911_v48, %v911_v48 }
  0x90   :  { %v37_v43 = vpop.xlane.xlu0 %36  ;;  %v917_v51 = vmul.f32 0.03125, %v53_v42 }
  0x91   :  { %v913_v49 = vmul.f32 0.03125, %v37_v43 }
  0x92   :  { %v155_v62 = vmul.f32 %v917_v51, %v917_v51 }
  0x93   :  { %v41_v44 = vpop.xlane.xlu1 %40  ;;  %v147_v55 = vmul.f32 %v913_v49, %v913_v49 }
  0x94   :  { %v39_v45 = vpop.xlane.xlu0 %38  ;;  %v923_v58 = vmul.f32 0.03125, %v41_v44 }
  0x95   :  { %v929_v63 = vmul.f32 0.03125, %v39_v45 }
  0x96   :  { %v149_v14 = vmul.f32 %v923_v58, %v923_v58 }
  0x97   :  { %v57_v46 = vpop.xlane.xlu1 %56  ;;  %v148_v21 = vmul.f32 %v929_v63, %v929_v63 }
  0x98   :  { %v55_v47 = vpop.xlane.xlu0 %54  ;;  %v935_v24 = vmul.f32 0.03125, %v57_v46 }
  0x99   :  { %v937_v27 = vmul.f32 0.03125, %v55_v47 }
  0x9a   :  { %v157_v36 = vmul.f32 %v935_v24, %v935_v24 }
  0x9b   :  { %v101_v52 = vpop.xlane.xlu1 %100  ;;  %v156_v37 = vmul.f32 %v937_v27, %v937_v27 }
  0x9c   :  { %v99_v53 = vpop.xlane.xlu0 %98  ;;  %v131_v56 = vmul.f32 0.03125, %v101_v52 }
  0x9d   :  { %v130_v57 = vmul.f32 0.03125, %v99_v53 }
  0x9e   :  { %v163_v59 = vsub.f32 %v131_v56, %v147_v55  ;;  %v210_v56 = vsub.f32 %v767_v1, %v911_v48  ;;  %v218_v48 = vsub.f32 %v762_v0, %v915_v50  ;;  %v212_v0 = vsub.f32 %v791_v5, %v929_v63 }
  0x9f   :  { %v162_v60 = vsub.f32 %v130_v57, %v146_v54  ;;  %v117_v8 = vpop.xlane.xlu1 %116  ;;  %v211_v54 = vsub.f32 %v779_v3, %v913_v49  ;;  %v957_v3 = vld [vmem:[%s1076_s2] ss:$0 sm:$0xff]  ;;  %v221_v5 = vsub.f32 %v798_v6, %v935_v24  ;;  %v220_v63 = vsub.f32 %v803_v7, %v937_v27 }
  0xa0   :  { %v115_v9 = vpop.xlane.xlu0 %114  ;;  %v179_v10 = vadd.f32 1e-05, %v163_v59  ;;  %v139_v12 = vmul.f32 0.03125, %v117_v8 }
  0xa1   :  { %v178_v11 = vadd.f32 1e-05, %v162_v60  ;;  %v138_v13 = vmul.f32 0.03125, %v115_v9  ;;  %v219_v9 = vsub.f32 %v774_v2, %v917_v51 }
  0xa2   :  { %702 = vrsqrt.f32 %v179_v10  ;;  %v171_v15 = vsub.f32 %v139_v12, %v155_v62  ;;  %v950_v62 = vld [vmem:[%s1075_s1] ss:$0 sm:$0xff] }
  0xa3   :  { %v170_v18 = vsub.f32 %v138_v13, %v154_v61  ;;  %704 = vrsqrt.f32 %v178_v11  ;;  %v105_v28 = vpop.xlane.xlu1 %104 }
  0xa4   :  { %v103_v29 = vpop.xlane.xlu0 %102  ;;  %v187_v30 = vadd.f32 1e-05, %v171_v15  ;;  %v133_v32 = vmul.f32 0.03125, %v105_v28 }
  0xa5   :  { %v186_v31 = vadd.f32 1e-05, %v170_v18  ;;  %v132_v33 = vmul.f32 0.03125, %v103_v29  ;;  %v213_v18 = vsub.f32 %v786_v4, %v923_v58 }
  0xa6   :  { %706 = vrsqrt.f32 %v187_v30  ;;  %v165_v34 = vsub.f32 %v133_v32, %v149_v14 }
  0xa7   :  { %v164_v35 = vsub.f32 %v132_v33, %v148_v21  ;;  %708 = vrsqrt.f32 %v186_v31  ;;  %v121_v38 = vpop.xlane.xlu1 %120 }
  0xa8   :  { %v119_v39 = vpop.xlane.xlu0 %118  ;;  %v181_v40 = vadd.f32 1e-05, %v165_v34  ;;  %v141_v42 = vmul.f32 0.03125, %v121_v38 }
  0xa9   :  { %v180_v41 = vadd.f32 1e-05, %v164_v35  ;;  %v140_v43 = vmul.f32 0.03125, %v119_v39 }
  0xaa   :  { %710 = vrsqrt.f32 %v181_v40  ;;  %v173_v44 = vsub.f32 %v141_v42, %v157_v36 }
  0xab   :  { %v172_v45 = vsub.f32 %v140_v43, %v156_v37  ;;  %712 = vrsqrt.f32 %v180_v41  ;;  %v45_v46 = vpop.xlane.xlu1 %44 }
  0xac   :  { %v43_v47 = vpop.xlane.xlu0 %42  ;;  %v189_v52 = vadd.f32 1e-05, %v173_v44  ;;  %v967_v21 = vmul.f32 0.03125, %v45_v46 }
  0xad   :  { %v188_v53 = vadd.f32 1e-05, %v172_v45  ;;  %v973_v34 = vmul.f32 0.03125, %v43_v47 }
  0xae   :  { %714 = vrsqrt.f32 %v189_v52  ;;  %v151_v37 = vmul.f32 %v967_v21, %v967_v21 }
  0xaf   :  { %v703_v55 = vpop.eup %702  ;;  %716 = vrsqrt.f32 %v188_v53  ;;  %v61_v57 = vpop.xlane.xlu1 %60  ;;  %v150_v6 = vmul.f32 %v973_v34, %v973_v34 }
  0xb0   :  { %v59_v59 = vpop.xlane.xlu0 %58  ;;  %v705_v60 = vpop.eup %704  ;;  %v227_v61 = vmul.f32 %v703_v55, %v211_v54  ;;  %v983_v38 = vmul.f32 0.03125, %v61_v57 }
  0xb1   :  { %v226_v8 = vmul.f32 %v705_v60, %v210_v56  ;;  %v985_v40 = vmul.f32 0.03125, %v59_v59 }
  0xb2   :  { %v250_v12 = vmul.f32 %v950_v62, %v227_v61  ;;  %v159_v60 = vmul.f32 %v983_v38, %v983_v38 }
  0xb3   :  { %v707_v1 = vpop.eup %706  ;;  %v49_v49 = vpop.xlane.xlu1 %48  ;;  %v249_v11 = vmul.f32 %v950_v62, %v226_v8  ;;  %v158_v61 = vmul.f32 %v985_v40, %v985_v40 }
  0xb4   :  { %v47_v10 = vpop.xlane.xlu0 %46  ;;  %v709_v13 = vpop.eup %708  ;;  %v235_v14 = vmul.f32 %v707_v1, %v219_v9  ;;  %v273_v2 = vadd.f32 %v957_v3, %v250_v12  ;;  %v991_v47 = vmul.f32 0.03125, %v49_v49 }
  0xb5   :  { %v272_v15 = vadd.f32 %v957_v3, %v249_v11  ;;  %v234_v51 = vmul.f32 %v709_v13, %v218_v48  ;;  %v995_v55 = vmul.f32 0.03125, %v47_v10 }
  0xb6   :  { %v258_v32 = vmul.f32 %v950_v62, %v235_v14  ;;  %v153_v13 = vmul.f32 %v991_v47, %v991_v47 }
  0xb7   :  { %v711_v28 = vpop.eup %710  ;;  %v65_v50 = vpop.xlane.xlu1 %64  ;;  %v288_v30 = vpack.c.bf16 %v273_v2, %v272_v15  ;;  %v257_v31 = vmul.f32 %v950_v62, %v234_v51  ;;  %v152_v2 = vmul.f32 %v995_v55, %v995_v55 }
  0xb8   :  { %v63_v29 = vpop.xlane.xlu0 %62  ;;  %v713_v33 = vpop.eup %712  ;;  %v229_v35 = vmul.f32 %v711_v28, %v213_v18  ;;  %v281_v58 = vadd.f32 %v957_v3, %v258_v32  ;;  %v1009_v28 = vmul.f32 0.03125, %v65_v50 }
  0xb9   :  { %662 = vmatprep.mubr.bf16.mxu0 %v288_v30  ;;  %v280_v4 = vadd.f32 %v957_v3, %v257_v31  ;;  %v228_v36 = vmul.f32 %v713_v33, %v212_v0  ;;  %v1011_v0 = vmul.f32 0.03125, %v63_v29 }
  0xba   :  { %v252_v45 = vmul.f32 %v950_v62, %v229_v35 }
  0xbb   :  { %v715_v39 = vpop.eup %714  ;;  %v109_v41 = vpop.xlane.xlu1 %108  ;;  %v292_v43 = vpack.c.bf16 %v281_v58, %v280_v4  ;;  %v251_v44 = vmul.f32 %v950_v62, %v228_v36  ;;  %v160_v50 = vmul.f32 %v1011_v0, %v1011_v0 }
  0xbc   :  { %v107_v42 = vpop.xlane.xlu0 %106  ;;  %v717_v46 = vpop.eup %716  ;;  %v135_v7 = vmul.f32 0.03125, %v109_v41  ;;  %v237_v27 = vmul.f32 %v715_v39, %v221_v5  ;;  %v275_v53 = vadd.f32 %v957_v3, %v252_v45 }
  0xbd   :  { %v134_v24 = vmul.f32 0.03125, %v107_v42  ;;  %670 = vmatprep.mubr.bf16.mxu1 %v292_v43  ;;  %v274_v52 = vadd.f32 %v957_v3, %v251_v44  ;;  %v236_v54 = vmul.f32 %v717_v46, %v220_v63  ;;  %v161_v63 = vmul.f32 %v1009_v28, %v1009_v28 }
  0xbe   :  { %v167_v56 = vsub.f32 %v135_v7, %v151_v37  ;;  %v260_v59 = vmul.f32 %v950_v62, %v237_v27  ;;  %v215_v7 = vsub.f32 %v826_v16, %v967_v21  ;;  %v214_v27 = vsub.f32 %v831_v17, %v973_v34 }
  0xbf   :  { %v166_v57 = vsub.f32 %v134_v24, %v150_v6  ;;  %v125_v8 = vpop.xlane.xlu1 %124  ;;  %v289_v1 = vpack.c.bf16 %v275_v53, %v274_v52  ;;  %v259_v48 = vmul.f32 %v950_v62, %v236_v54 }
  0xc0   :  { %v123_v9 = vpop.xlane.xlu0 %122  ;;  %v183_v49 = vadd.f32 1e-05, %v167_v56  ;;  %v143_v12 = vmul.f32 0.03125, %v125_v8  ;;  %v283_v15 = vadd.f32 %v957_v3, %v260_v59  ;;  %v223_v56 = vsub.f32 %v839_v19, %v983_v38 }
  0xc1   :  { %v182_v11 = vadd.f32 1e-05, %v166_v57  ;;  %v142_v10 = vmul.f32 0.03125, %v123_v9  ;;  %663 = vmatmul.mubr.bf16.vlgmr.msra.gmra.mxu0 %v289_v1  ;;  %v282_v14 = vadd.f32 %v957_v3, %v259_v48  ;;  %v217_v9 = vsub.f32 %v856_v22, %v991_v47 }
  0xc2   :  { %718 = vrsqrt.f32 %v183_v49  ;;  %v175_v51 = vsub.f32 %v143_v12, %v159_v60  ;;  %v222_v60 = vsub.f32 %v844_v20, %v985_v40  ;;  %v216_v1 = vsub.f32 %v861_v23, %v995_v55 }
  0xc3   :  { %v174_v18 = vsub.f32 %v142_v10, %v158_v61  ;;  %720 = vrsqrt.f32 %v182_v11  ;;  %v113_v30 = vpop.xlane.xlu1 %112  ;;  %v293_v32 = vpack.c.bf16 %v283_v15, %v282_v14  ;;  %v225_v22 = vsub.f32 %v871_v25, %v1009_v28 }
  0xc4   :  { %v111_v31 = vpop.xlane.xlu0 %110  ;;  %v191_v33 = vadd.f32 1e-05, %v175_v51  ;;  %v137_v4 = vmul.f32 0.03125, %v113_v30  ;;  %v224_v23 = vsub.f32 %v876_v26, %v1011_v0 }
  0xc5   :  { %v190_v35 = vadd.f32 1e-05, %v174_v18  ;;  %v136_v58 = vmul.f32 0.03125, %v111_v31  ;;  %671 = vmatmul.mubr.bf16.vlgmr.msra.gmra.mxu1 %v293_v32 }
  0xc6   :  { %722 = vrsqrt.f32 %v191_v33  ;;  %v169_v36 = vsub.f32 %v137_v4, %v153_v13 }
  0xc7   :  { %v168_v5 = vsub.f32 %v136_v58, %v152_v2  ;;  %724 = vrsqrt.f32 %v190_v35  ;;  %v129_v29 = vpop.xlane.xlu1 %128 }
  0xc8   :  { %v127_v37 = vpop.xlane.xlu0 %126  ;;  %v185_v39 = vadd.f32 1e-05, %v169_v36  ;;  %v145_v42 = vmul.f32 0.03125, %v129_v29 }
  0xc9   :  { %v184_v41 = vadd.f32 1e-05, %v168_v5  ;;  %v144_v43 = vmul.f32 0.03125, %v127_v37 }
  0xca   :  { %726 = vrsqrt.f32 %v185_v39  ;;  %v177_v44 = vsub.f32 %v145_v42, %v161_v63 }
  0xcb   :  { %v176_v45 = vsub.f32 %v144_v43, %v160_v50  ;;  %728 = vrsqrt.f32 %v184_v41 }
  0xcc   :  { %v193_v46 = vadd.f32 1e-05, %v177_v44 }
  0xcd   :  { %v192_v6 = vadd.f32 1e-05, %v176_v45 }
  0xce   :  { %730 = vrsqrt.f32 %v193_v46 }
  0xcf   :  { %v719_v24 = vpop.eup %718  ;;  %732 = vrsqrt.f32 %v192_v6 }
  0xd0   :  { %v721_v52 = vpop.eup %720  ;;  %v231_v53 = vmul.f32 %v719_v24, %v215_v7 }
  0xd1   :  { %v230_v54 = vmul.f32 %v721_v52, %v214_v27 }
  0xd2   :  { %v254_v57 = vmul.f32 %v950_v62, %v231_v53 }
  0xd3   :  { %v723_v59 = vpop.eup %722  ;;  %v253_v16 = vmul.f32 %v950_v62, %v230_v54 }
  0xd4   :  { %v725_v21 = vpop.eup %724  ;;  %v277_v61 = vadd.f32 %v957_v3, %v254_v57  ;;  %v239_v8 = vmul.f32 %v723_v59, %v223_v56 }
  0xd5   :  { %v276_v17 = vadd.f32 %v957_v3, %v253_v16  ;;  %v238_v34 = vmul.f32 %v725_v21, %v222_v60 }
  0xd6   :  { %v262_v19 = vmul.f32 %v950_v62, %v239_v8 }
  0xd7   :  { %v727_v38 = vpop.eup %726  ;;  %v290_v48 = vpack.c.bf16 %v277_v61, %v276_v17  ;;  %v261_v20 = vmul.f32 %v950_v62, %v238_v34 }
  0xd8   :  { %v729_v40 = vpop.eup %728  ;;  %v285_v49 = vadd.f32 %v957_v3, %v262_v19  ;;  %v233_v11 = vmul.f32 %v727_v38, %v217_v9 }
  0xd9   :  { %666 = vmatprep.mubr.bf16.mxu0 %v290_v48  ;;  %v284_v12 = vadd.f32 %v957_v3, %v261_v20  ;;  %v232_v10 = vmul.f32 %v729_v40, %v216_v1 }
  0xda   :  { %v256_v47 = vmul.f32 %v950_v62, %v233_v11 }
  0xdb   :  { %v731_v13 = vpop.eup %730  ;;  %v294_v55 = vpack.c.bf16 %v285_v49, %v284_v12  ;;  %v255_v14 = vmul.f32 %v950_v62, %v232_v10 }
  0xdc   :  { %v733_v15 = vpop.eup %732  ;;  %v279_v2 = vadd.f32 %v957_v3, %v256_v47  ;;  %v241_v51 = vmul.f32 %v731_v13, %v225_v22 }
  0xdd   :  { %674 = vmatprep.mubr.bf16.mxu1 %v294_v55  ;;  %v278_v18 = vadd.f32 %v957_v3, %v255_v14  ;;  %v240_v30 = vmul.f32 %v733_v15, %v224_v23 }
  0xde   :  { %v264_v31 = vmul.f32 %v950_v62, %v241_v51 }
  0xdf   :  { %v291_v25 = vpack.c.bf16 %v279_v2, %v278_v18  ;;  %v263_v28 = vmul.f32 %v950_v62, %v240_v30 }
  0xe0   :  { %v287_v32 = vadd.f32 %v957_v3, %v264_v31 }
  0xe1   :  { %667 = vmatmul.mubr.bf16.gmra.mxu0 %v291_v25  ;;  %v286_v26 = vadd.f32 %v957_v3, %v263_v28 }
  0xe3   :  { %v295_v0 = vpack.c.bf16 %v287_v32, %v286_v26 }
  0xe5   :  { %675 = vmatmul.mubr.bf16.gmra.mxu1 %v295_v0 }
 0x181   :  { %v664_v33 = vpop.f32.mrf.mxu0 }
 0x183   :  { %v394_v35 = vpop.f32.mrf.mxu0 }
 0x185   :  { %v665_v4 = vpop.f32.mrf.mxu0  ;;  %v672_v58 = vpop.f32.mrf.mxu1 }
 0x186   :  { %v591_v36 = vpack.c.bf16 %v665_v4, %v664_v33 }
 0x187   :  { %v397_v5 = vpop.f32.mrf.mxu0  ;;  %v426_v63 = vpop.f32.mrf.mxu1 }
 0x188   :  { %623 = vst [vmem:[%s1077_s4 + $0x8] sm:$0xff] %v591_v36   ;;  %v586_v50 = vpack.c.bf16 %v397_v5, %v394_v35 }
 0x189   :  { %v673_v62 = vpop.f32.mrf.mxu1 }
 0x18a   :  { %587 = vst [vmem:[%s1077_s4] sm:$0xff] %v586_v50   ;;  %v611_v3 = vpack.c.bf16 %v673_v62, %v672_v58 }
 0x18b   :  { %v429_v29 = vpop.f32.mrf.mxu1 }
 0x18c   :  { %627 = vst [vmem:[%s1077_s4 + $0x28] sm:$0xff] %v611_v3   ;;  %v606_v37 = vpack.c.bf16 %v429_v29, %v426_v63 }
 0x18e   :  { %626 = vst [vmem:[%s1077_s4 + $0x20] sm:$0xff] %v606_v37  }
 0x1a1   :  { %v668_v39 = vpop.f32.mrf.mxu0 }
 0x1a3   :  { %v410_v41 = vpop.f32.mrf.mxu0 }
 0x1a5   :  { %v669_v42 = vpop.f32.mrf.mxu0  ;;  %v676_v43 = vpop.f32.mrf.mxu1 }
 0x1a6   :  { %v601_v44 = vpack.c.bf16 %v669_v42, %v668_v39 }
 0x1a7   :  { %v413_v45 = vpop.f32.mrf.mxu0  ;;  %v442_v46 = vpop.f32.mrf.mxu1 }
 0x1a8   :  { %625 = vst [vmem:[%s1077_s4 + $0x18] sm:$0xff] %v601_v44   ;;  %v596_v6 = vpack.c.bf16 %v413_v45, %v410_v41 }
 0x1a9   :  { %v677_v7 = vpop.f32.mrf.mxu1 }
 0x1aa   :  { %624 = vst [vmem:[%s1077_s4 + $0x10] sm:$0xff] %v596_v6   ;;  %v621_v24 = vpack.c.bf16 %v677_v7, %v676_v43 }
 0x1ab   :  { %v445_v27 = vpop.f32.mrf.mxu1 }
 0x1ac   :  { %629 = vst [vmem:[%s1077_s4 + $0x38] sm:$0xff] %v621_v24   ;;  %v616_v52 = vpack.c.bf16 %v445_v27, %v442_v46 }
 0x1ae   :  { %628 = vst [vmem:[%s1077_s4 + $0x30] sm:$0xff] %v616_v52  }

</bundles_post_ra>
